<compile_context>
chip_gen: v7x
topology: tpu7x:2x2x1
jax: 0.10.0
libtpu: 0.0.40
codegen_flags: <defaults>
</compile_context>

<pallas_src>
from functools import partial

import jax
import jax.numpy as jnp
from jax.experimental import pallas as pl
from jax.experimental.pallas import tpu as pltpu

MAX_ = 3
STEP = 2
MODULUS = MAX_ + 1          # 4; power of two -> & (MODULUS-1) == % MODULUS

LANES = 128                 # vreg lane width
SUBLANES = 8                # f32 sublane tile
ROW_ALIGN = 32              # int8 sublane tile; also a multiple of bf16(16)/f32(8)


def _round_up(x, m):
    return ((x + m - 1) // m) * m


def _circ_acc_partial_kernel(x_ref, t_ref, o_ref):
    """Per-tile partial sums of the circularly-gathered class scores.

    x_ref: (MODULUS, R, 128)  class-planar, lane-dense scores (bf16 or f32)
    t_ref: (R, 128) int8      raw target, one byte per sample
    o_ref: (1, 8, 128) f32    per-tile partial sums (reduced in the wrapper)
    """
    t = t_ref[...].astype(jnp.int32)
    # Circular remap of the target: (target + step) % (max_ + 1).  The bit
    # mask equals Python/torch % for any two's-complement integer.
    t_shift = (t + STEP) & (MODULUS - 1)

    # Purely elementwise one-hot select across the MODULUS class planes
    # (static 4-iteration loop).  Padded tail samples have zeros in every
    # plane, so they contribute nothing regardless of their target byte.
    picked = jnp.zeros(t_shift.shape, jnp.float32)
    for cls in range(MODULUS):
        picked = jnp.where(t_shift == cls, x_ref[cls].astype(jnp.float32), picked)

    # Reduce the row-major axis with whole-vreg adds (no XLU) and emit a full
    # (8, 128) sublane group -> unmasked lane-dense store.  The cross-tile /
    # cross-lane reduction happens once, outside the kernel.
    r = picked.shape[0]
    o_ref[0] = jnp.sum(picked.reshape(r // SUBLANES, SUBLANES, LANES), axis=0)


@partial(jax.jit, static_argnames=("max_tile_rows", "wire_dtype"))
def circular_accuracy_loss(inputs, target, *, max_tile_rows=4096,
                           wire_dtype=jnp.bfloat16):
    """inputs: (N, C) float, target: (N,) int. Returns scalar f32 loss."""
    n, c = inputs.shape

    # Only columns [0, MODULUS) can ever be gathered (t_shift is in [0, MODULUS)).
    # NOTE: if C < MODULUS, an out-of-range gather contributes 0 instead of
    # raising like PyTorch advanced indexing would.
    # TODO(synk): optionally mirror PyTorch's error when C < MODULUS.
    if c >= MODULUS:
        x_rel = inputs[:, :MODULUS]
    else:
        x_rel = jnp.pad(inputs, ((0, 0), (0, MODULUS - c)))
    x_rel = x_rel.astype(wire_dtype)

    # ---- tile sizing (all static) ------------------------------------------
    rows_needed = max(1, pl.cdiv(n, LANES))                 # 128 samples / row
    max_tile_rows = max(ROW_ALIGN, _round_up(max_tile_rows, ROW_ALIGN))
    tile_rows = min(max_tile_rows, _round_up(rows_needed, ROW_ALIGN))
    # v7x: once there is enough data (>= ~32K samples), keep at least 2 tiles
    # so the "parallel" grid axis can shard across both TensorCores.
    if rows_needed >= 8 * ROW_ALIGN:
        tile_rows = min(tile_rows, _round_up(pl.cdiv(rows_needed, 2), ROW_ALIGN))
    rows_padded = _round_up(rows_needed, tile_rows)
    num_tiles = rows_padded // tile_rows
    n_padded = rows_padded * LANES

    # ---- single fused repack copy (under jit) ------------------------------
    # Class-planar, lane-dense: x_planar[c, r, l] = input[r*128 + l, c].
    x_planar = jnp.pad(x_rel.T, ((0, 0), (0, n_padded - n))).reshape(
        MODULUS, rows_padded, LANES)
    # Target once per sample, int8 (mod-4 result is unaffected by the cast).
    t_planar = jnp.pad(target.astype(jnp.int8), (0, n_padded - n)).reshape(
        rows_padded, LANES)

    partials = pl.pallas_call(
        _circ_acc_partial_kernel,
        out_shape=jax.ShapeDtypeStruct((num_tiles, SUBLANES, LANES), jnp.float32),
        grid=(num_tiles,),
        in_specs=[
            pl.BlockSpec((MODULUS, tile_rows, LANES), lambda i: (0, i, 0)),
            pl.BlockSpec((tile_rows, LANES), lambda i: (i, 0)),
        ],
        out_specs=pl.BlockSpec((1, SUBLANES, LANES), lambda i: (i, 0, 0)),
        compiler_params=pltpu.CompilerParams(
            dimension_semantics=("parallel",),   # shards row tiles across TCs on v7x
            vmem_limit_bytes=48 * 1024 * 1024,   # default tiles use well under this
        ),
    )(x_planar, t_planar)

    # Tiny fused epilogue: one cross-tile/cross-lane reduction + scalar math,
    # divided by the *global* N.
    total = jnp.sum(partials)
    return (jnp.float32(1.0) - total / jnp.float32(n)).astype(jnp.float32)


def _reference(inputs, target):
    t = (target + STEP) % MODULUS
    picked = inputs[jnp.arange(inputs.shape[0]), t]
    return 1.0 - picked.mean()


if __name__ == "__main__":
    key = jax.random.PRNGKey(0)
    k1, k2, k3, k4 = jax.random.split(key, 4)

    # Small primary shape: batch=8, classes=MODULUS (=4), softmax-like rows.
    N, C = 8, MODULUS
    x = jax.nn.softmax(jax.random.uniform(k1, (N, C), dtype=jnp.float32), axis=-1)
    tgt = jax.random.randint(k2, (N,), 0, MODULUS, dtype=jnp.int32)
    ref = _reference(x, tgt)

    # f32 wire format: exact match.
    loss_f32 = circular_accuracy_loss(x, tgt, wire_dtype=jnp.float32)
    jax.block_until_ready(loss_f32)
    assert jnp.allclose(loss_f32, ref, atol=1e-5), (loss_f32, ref)

    # Default bf16 wire format: halves kernel HBM reads, tiny quantization.
    loss_bf16 = circular_accuracy_loss(x, tgt)
    jax.block_until_ready(loss_bf16)
    assert jnp.allclose(loss_bf16, ref, atol=2e-3), (loss_bf16, ref)

    # Wider head + multiple tiles (exercises column slicing, tail padding,
    # multi-step parallel grid).
    N2, C2 = 5000, 12
    x2 = jax.nn.softmax(jax.random.uniform(k3, (N2, C2), dtype=jnp.float32), axis=-1)
    tgt2 = jax.random.randint(k4, (N2,), 0, MODULUS, dtype=jnp.int32)
    loss2 = circular_accuracy_loss(x2, tgt2, max_tile_rows=32)
    jax.block_until_ready(loss2)
    ref2 = _reference(x2, tgt2)
    assert jnp.allclose(loss2, ref2, atol=2e-3), (loss2, ref2)

    print("KERNEL_OK")
</pallas_src>

<mosaic_0001>
module attributes {stable_mosaic.version = 11 : i64} {
  func.func @_circ_acc_partial_kernel(%arg0: i32, %arg1: memref<4x32x128xf32, #tpu.memory_space<vmem>>, %arg2: memref<32x128xi8, #tpu.memory_space<vmem>>, %arg3: memref<1x8x128xf32, #tpu.memory_space<vmem>>) attributes {dimension_semantics = [#tpu.dimension_semantics<parallel>], iteration_bounds = array<i64: 1>, scalar_prefetch = 0 : i64, scratch_operands = 0 : i64, tpu.core_type = #tpu.core_type<tc>, window_params = [{transform_indices = @transform_0, window_bounds = array<i64: 4, 32, 128>}, {transform_indices = @transform_1, window_bounds = array<i64: 32, 128>}, {transform_indices = @transform_2, window_bounds = array<i64: 1, 8, 128>}]} {
    %c0 = arith.constant 0 : index
    %c0_0 = arith.constant 0 : index
    %0 = vector.load %arg2[%c0, %c0_0] : memref<32x128xi8, #tpu.memory_space<vmem>>, vector<32x128xi8>
    %1 = arith.extsi %0 : vector<32x128xi8> to vector<32x128xi32>
    %c2_i32 = arith.constant 2 : i32
    %2 = vector.broadcast %c2_i32 : i32 to vector<32x128xi32>
    %3 = arith.addi %1, %2 : vector<32x128xi32>
    %c3_i32 = arith.constant 3 : i32
    %4 = vector.broadcast %c3_i32 : i32 to vector<32x128xi32>
    %5 = arith.andi %3, %4 : vector<32x128xi32>
    %cst = arith.constant 0.000000e+00 : f32
    %6 = vector.broadcast %cst : f32 to vector<32x128xf32>
    %c0_i32 = arith.constant 0 : i32
    %7 = vector.broadcast %c0_i32 : i32 to vector<32x128xi32>
    %8 = arith.cmpi eq, %5, %7 : vector<32x128xi32>
    %c0_1 = arith.constant 0 : index
    %c0_2 = arith.constant 0 : index
    %c0_3 = arith.constant 0 : index
    %9 = vector.load %arg1[%c0_1, %c0_2, %c0_3] : memref<4x32x128xf32, #tpu.memory_space<vmem>>, vector<1x32x128xf32>
    %10 = vector.shape_cast %9 : vector<1x32x128xf32> to vector<32x128xf32>
    %11 = arith.select %8, %10, %6 : vector<32x128xi1>, vector<32x128xf32>
    %c1_i32 = arith.constant 1 : i32
    %12 = vector.broadcast %c1_i32 : i32 to vector<32x128xi32>
    %13 = arith.cmpi eq, %5, %12 : vector<32x128xi32>
    %c1 = arith.constant 1 : index
    %c0_4 = arith.constant 0 : index
    %c0_5 = arith.constant 0 : index
    %14 = vector.load %arg1[%c1, %c0_4, %c0_5] : memref<4x32x128xf32, #tpu.memory_space<vmem>>, vector<1x32x128xf32>
    %15 = vector.shape_cast %14 : vector<1x32x128xf32> to vector<32x128xf32>
    %16 = arith.select %13, %15, %11 : vector<32x128xi1>, vector<32x128xf32>
    %c2_i32_6 = arith.constant 2 : i32
    %17 = vector.broadcast %c2_i32_6 : i32 to vector<32x128xi32>
    %18 = arith.cmpi eq, %5, %17 : vector<32x128xi32>
    %c2 = arith.constant 2 : index
    %c0_7 = arith.constant 0 : index
    %c0_8 = arith.constant 0 : index
    %19 = vector.load %arg1[%c2, %c0_7, %c0_8] : memref<4x32x128xf32, #tpu.memory_space<vmem>>, vector<1x32x128xf32>
    %20 = vector.shape_cast %19 : vector<1x32x128xf32> to vector<32x128xf32>
    %21 = arith.select %18, %20, %16 : vector<32x128xi1>, vector<32x128xf32>
    %c3_i32_9 = arith.constant 3 : i32
    %22 = vector.broadcast %c3_i32_9 : i32 to vector<32x128xi32>
    %23 = arith.cmpi eq, %5, %22 : vector<32x128xi32>
    %c3 = arith.constant 3 : index
    %c0_10 = arith.constant 0 : index
    %c0_11 = arith.constant 0 : index
    %24 = vector.load %arg1[%c3, %c0_10, %c0_11] : memref<4x32x128xf32, #tpu.memory_space<vmem>>, vector<1x32x128xf32>
    %25 = vector.shape_cast %24 : vector<1x32x128xf32> to vector<32x128xf32>
    %26 = arith.select %23, %25, %21 : vector<32x128xi1>, vector<32x128xf32>
    %27 = vector.shape_cast %26 : vector<32x128xf32> to vector<4x8x128xf32>
    %cst_12 = arith.constant dense<0.000000e+00> : vector<8x128xf32>
    %28 = vector.multi_reduction <add>, %27, %cst_12 [0] : vector<4x8x128xf32> to vector<8x128xf32>
    %c0_13 = arith.constant 0 : index
    %c0_14 = arith.constant 0 : index
    %c0_15 = arith.constant 0 : index
    %29 = vector.load %arg3[%c0_13, %c0_14, %c0_15] : memref<1x8x128xf32, #tpu.memory_space<vmem>>, vector<1x8x128xf32>
    %30 = vector.shape_cast %29 : vector<1x8x128xf32> to vector<8x128xf32>
    %31 = vector.shape_cast %28 : vector<8x128xf32> to vector<1x8x128xf32>
    tpu.vector_store %arg3[%c0_13, %c0_14, %c0_15], %31 {strides = array<i32>} : memref<1x8x128xf32, #tpu.memory_space<vmem>>, vector<1x8x128xf32>,
    return
  }
  func.func @transform_0(%arg0: i32) -> (i32, i32, i32) {
    %c0_i32 = arith.constant 0 : i32
    %c0_i32_0 = arith.constant 0 : i32
    %c0_i32_1 = arith.constant 0 : i32
    return %c0_i32, %arg0, %c0_i32_0 : i32, i32, i32
  }
  func.func @transform_1(%arg0: i32) -> (i32, i32) {
    %c0_i32 = arith.constant 0 : i32
    %c0_i32_0 = arith.constant 0 : i32
    return %arg0, %c0_i32 : i32, i32
  }
  func.func @transform_2(%arg0: i32) -> (i32, i32, i32) {
    %c0_i32 = arith.constant 0 : i32
    %c0_i32_0 = arith.constant 0 : i32
    %c0_i32_1 = arith.constant 0 : i32
    return %arg0, %c0_i32, %c0_i32_0 : i32, i32, i32
  }
}

</mosaic_0001>

<bundles_post_ra>
// kernel: circular_accuracy_loss.1
= control target key start
LH: loop header
LB: loop body
LE: loop exit
PB: predicated region body
PF: predicated region fallthrough
CT: control target
= control target key end

     0   :  { %s164_s1 = inlined_call_operand.vmem [shape: s8[32,128], index: 1, kind: input, shape index: {}]   ;;  %s165_s0 = inlined_call_operand.vmem [shape: f32[4,32,128], index: 0, kind: input, shape index: {}]   ;;  %s166_s2 = inlined_call_operand.vmem [shape: f32[1,8,128], index: 2, kind: output, shape index: {}]  }
   0x1   :  { %v11_v0 = vld [vmem:[%s164_s1] sm:$0xff]  ;;  %v29_v10 = vld [vmem:[%s165_s0 + $0x8] sm:$0xff]  ;;  %v30_v15 = vld [vmem:[%s165_s0 + $0x10] sm:$0xff] }
   0x2   :  { %v12_v1 = vunpack.c.0.s8 %v11_v0  ;;  %v13_v2 = vunpack.c.1.s8 %v11_v0  ;;  %v14_v3 = vunpack.c.2.s8 %v11_v0  ;;  %v15_v4 = vunpack.c.3.s8 %v11_v0  ;;  %v28_v9 = vld [vmem:[%s165_s0] sm:$0xff]  ;;  %v31_v16 = vld [vmem:[%s165_s0 + $0x18] sm:$0xff]  ;;  %v84_v18 = vld [vmem:[%s165_s0 + $0x28] sm:$0xff] }
   0x3   :  { %v83_v17 = vld [vmem:[%s165_s0 + $0x20] sm:$0xff]  ;;  %v85_v19 = vld [vmem:[%s165_s0 + $0x30] sm:$0xff]  ;;  %v86_v20 = vld [vmem:[%s165_s0 + $0x38] sm:$0xff] }
   0x4   :  { %v16_v5 = vadd.s32 2, %v12_v1  ;;  %v17_v6 = vadd.s32 2, %v13_v2  ;;  %v18_v7 = vadd.s32 2, %v14_v3  ;;  %v19_v8 = vadd.s32 2, %v15_v4  ;;  %v87_v25 = vld [vmem:[%s165_s0 + $0x40] sm:$0xff]  ;;  %v88_v26 = vld [vmem:[%s165_s0 + $0x48] sm:$0xff] }
   0x5   :  { %v89_v27 = vld [vmem:[%s165_s0 + $0x50] sm:$0xff]  ;;  %v90_v28 = vld [vmem:[%s165_s0 + $0x58] sm:$0xff]  ;;  %v91_v33 = vld [vmem:[%s165_s0 + $0x60] sm:$0xff] }
   0x6   :  { %v20_v11 = vand.u32 3, %v16_v5  ;;  %v21_v12 = vand.u32 3, %v17_v6  ;;  %v22_v13 = vand.u32 3, %v18_v7  ;;  %v23_v14 = vand.u32 3, %v19_v8  ;;  %v92_v34 = vld [vmem:[%s165_s0 + $0x68] sm:$0xff]  ;;  %v93_v35 = vld [vmem:[%s165_s0 + $0x70] sm:$0xff] }
   0x7   :  { %v94_v40 = vld [vmem:[%s165_s0 + $0x78] sm:$0xff] }
   0x8   :  { %vm24_vm0 = vcmp.eq.s32.totalorder %v20_v11, 0  ;;  %vm25_vm1 = vcmp.eq.s32.totalorder %v21_v12, 0  ;;  %vm26_vm2 = vcmp.eq.s32.totalorder %v22_v13, 0  ;;  %vm27_vm3 = vcmp.eq.s32.totalorder %v23_v14, 0 }
   0x9   :  { %v32_v21 = vsel %vm24_vm0, %v28_v9, 0.0  ;;  %v33_v22 = vsel %vm25_vm1, %v29_v10, 0.0  ;;  %v34_v23 = vsel %vm26_vm2, %v30_v15, 0.0  ;;  %v35_v24 = vsel %vm27_vm3, %v31_v16, 0.0 }
   0xa   :  { %vm36_vm4 = vcmp.eq.s32.totalorder %v20_v11, 1  ;;  %vm37_vm5 = vcmp.eq.s32.totalorder %v21_v12, 1  ;;  %vm38_vm6 = vcmp.eq.s32.totalorder %v22_v13, 1  ;;  %vm39_vm7 = vcmp.eq.s32.totalorder %v23_v14, 1 }
   0xb   :  { %v45_v29 = vsel %vm36_vm4, %v83_v17, %v32_v21  ;;  %v46_v30 = vsel %vm37_vm5, %v84_v18, %v33_v22  ;;  %v47_v31 = vsel %vm38_vm6, %v85_v19, %v34_v23  ;;  %v48_v32 = vsel %vm39_vm7, %v86_v20, %v35_v24 }
   0xc   :  { %vm49_vm8 = vcmp.eq.s32.totalorder %v20_v11, 2  ;;  %vm50_vm9 = vcmp.eq.s32.totalorder %v21_v12, 2  ;;  %vm51_vm10 = vcmp.eq.s32.totalorder %v22_v13, 2  ;;  %vm52_vm11 = vcmp.eq.s32.totalorder %v23_v14, 2 }
   0xd   :  { %v58_v36 = vsel %vm49_vm8, %v87_v25, %v45_v29  ;;  %v59_v37 = vsel %vm50_vm9, %v88_v26, %v46_v30  ;;  %v60_v38 = vsel %vm51_vm10, %v89_v27, %v47_v31  ;;  %v61_v39 = vsel %vm52_vm11, %v90_v28, %v48_v32 }
   0xe   :  { %vm62_vm12 = vcmp.eq.s32.totalorder %v20_v11, 3  ;;  %vm63_vm13 = vcmp.eq.s32.totalorder %v21_v12, 3  ;;  %vm64_vm14 = vcmp.eq.s32.totalorder %v22_v13, 3  ;;  %vm65_vm15 = vcmp.eq.s32.totalorder %v23_v14, 3 }
   0xf   :  { %v71_v41 = vsel %vm62_vm12, %v91_v33, %v58_v36  ;;  %v72_v42 = vsel %vm63_vm13, %v92_v34, %v59_v37  ;;  %v73_v43 = vsel %vm64_vm14, %v93_v35, %v60_v38  ;;  %v74_v45 = vsel %vm65_vm15, %v94_v40, %v61_v39 }
  0x10   :  { %v75_v44 = vadd.f32 %v72_v42, %v71_v41 }
  0x12   :  { %v76_v46 = vadd.f32 %v75_v44, %v73_v43 }
  0x14   :  { %v77_v47 = vadd.f32 %v76_v46, %v74_v45 }
  0x16   :  { %78 = vst [vmem:[%s166_s2] sm:$0xff] %v77_v47 }

</bundles_post_ra>
